<compile_context>
chip_gen: v6e
topology: v6e:2x2x1
jax: 0.10.0
libtpu: 0.0.40
codegen_flags: <defaults>
</compile_context>

<pallas_src>
import jax
import jax.numpy as jnp
from jax.experimental import pallas as pl
from jax.experimental.pallas import tpu as pltpu


def _awl_kernel(losses_ref, log_s2_ref, out_ref):
    # losses_ref, log_s2_ref: (1, n) refs in VMEM (caller's native dtype).
    # out_ref: (1, 1) f32 in SMEM.
    losses = losses_ref[...].astype(jnp.float32)   # (1, n), upcast in-kernel
    log_s2 = log_s2_ref[...].astype(jnp.float32)   # (1, n)
    # sum_i [ losses_i / (2*exp(log_s2_i)) + log_s2_i / 2 ]
    #   = 0.5 * sum_i [ losses_i * exp(-log_s2_i) + log_s2_i ]
    # Vector body: one EUP exp + one vmul + one vadd + one XLU lane-reduce.
    # The 0.5 is a single scalar multiply after the reduce (idle scalar slot).
    s = jnp.sum(losses * jnp.exp(-log_s2) + log_s2)
    out_ref[0, 0] = 0.5 * s


def _awl_forward(losses, log_sigma2):
    n = losses.shape[0]
    assert log_sigma2.shape == (n,)
    # Two separate lane-dense (1, n) inputs -> two tiny back-to-back input DMAs
    # issued by Mosaic (they overlap); no stacked-array round trip through HBM.
    losses_2d = losses.reshape(1, n)
    log_s2_2d = log_sigma2.reshape(1, n)

    out = pl.pallas_call(
        _awl_kernel,
        out_shape=jax.ShapeDtypeStruct((1, 1), jnp.float32),
        in_specs=[
            pl.BlockSpec(memory_space=pltpu.VMEM),
            pl.BlockSpec(memory_space=pltpu.VMEM),
        ],
        out_specs=pl.BlockSpec(memory_space=pltpu.SMEM),
        cost_estimate=pl.CostEstimate(
            flops=4 * n,          # mul + add per lane, lane reduce, final scale
            transcendentals=n,    # one exp per task
            bytes_accessed=n * (losses.dtype.itemsize + log_sigma2.dtype.itemsize) + 4,
        ),
    )(losses_2d, log_s2_2d)
    return out[0, 0]


@jax.custom_vjp
def automatic_weighted_loss(losses, log_sigma2):
    """losses: (n,) array of scalar task losses; log_sigma2: (n,) parameter."""
    return _awl_forward(losses, log_sigma2)


def _awl_fwd(losses, log_sigma2):
    out = _awl_forward(losses, log_sigma2)
    return out, (losses, log_sigma2)


def _awl_bwd(res, g):
    losses, log_sigma2 = res
    losses_f = losses.astype(jnp.float32)
    log_s2_f = log_sigma2.astype(jnp.float32)
    g = g.astype(jnp.float32)
    inv_2sigma2 = 0.5 * jnp.exp(-log_s2_f)
    d_losses = (g * inv_2sigma2).astype(losses.dtype)
    d_log_s2 = (g * (-losses_f * inv_2sigma2 + 0.5)).astype(log_sigma2.dtype)
    return d_losses, d_log_s2


automatic_weighted_loss.defvjp(_awl_fwd, _awl_bwd)


def _awl_jnp(losses, log_sigma2):
    # Fusion-friendly pure-jnp equivalent (the recommended production path).
    return jnp.sum(losses * 0.5 * jnp.exp(-log_sigma2) + 0.5 * log_sigma2)


def automatic_weighted_loss_ref(losses, log_sigma2):
    # Pure-JAX reference mirroring the PyTorch loop.
    total = 0.0
    for i in range(losses.shape[0]):
        total = total + losses[i] / (2.0 * jnp.exp(log_sigma2[i])) + log_sigma2[i] / 2.0
    return total


if __name__ == "__main__":
    n = 2  # matches AutomaticWeightedLoss(n=2)

    # Deterministic parameter init: torch.ones(n), as in the module __init__.
    log_sigma2 = jnp.ones((n,), dtype=jnp.float32)

    # Deterministic example "task losses" (scalars), e.g. outputs of two loss heads.
    key = jax.random.PRNGKey(0)
    losses = jax.random.uniform(key, (n,), dtype=jnp.float32, minval=0.1, maxval=2.0)

    out = automatic_weighted_loss(losses, log_sigma2)
    out = jax.block_until_ready(out)

    ref = automatic_weighted_loss_ref(losses, log_sigma2)
    assert jnp.allclose(out, ref, rtol=1e-6, atol=1e-6), (out, ref)
    assert jnp.allclose(out, _awl_jnp(losses, log_sigma2), rtol=1e-6, atol=1e-6)

    # Gradient sanity check (custom VJP path).
    g_losses, g_log_s2 = jax.grad(automatic_weighted_loss, argnums=(0, 1))(losses, log_sigma2)
    gr_losses, gr_log_s2 = jax.grad(lambda a, b: _awl_jnp(a, b), argnums=(0, 1))(losses, log_sigma2)
    assert jnp.allclose(g_losses, gr_losses, rtol=1e-6, atol=1e-6)
    assert jnp.allclose(g_log_s2, gr_log_s2, rtol=1e-6, atol=1e-6)

    print("KERNEL_OK")
</pallas_src>

<mosaic_0001>
module attributes {stable_mosaic.version = 11 : i64} {
  func.func @_awl_kernel(%arg0: memref<1x2xf32, #tpu.memory_space<vmem>>, %arg1: memref<1x2xf32, #tpu.memory_space<vmem>>, %arg2: memref<1x1xf32, #tpu.memory_space<smem>>) attributes {dimension_semantics = [], scalar_prefetch = 0 : i64, scratch_operands = 0 : i64, tpu.core_type = #tpu.core_type<tc>} {
    %c0 = arith.constant 0 : index
    %c0_0 = arith.constant 0 : index
    %0 = vector.load %arg0[%c0, %c0_0] : memref<1x2xf32, #tpu.memory_space<vmem>>, vector<1x2xf32>
    %c0_1 = arith.constant 0 : index
    %c0_2 = arith.constant 0 : index
    %1 = vector.load %arg1[%c0_1, %c0_2] : memref<1x2xf32, #tpu.memory_space<vmem>>, vector<1x2xf32>
    %cst = arith.constant 0.000000e+00 : f32
    %2 = vector.broadcast %cst : f32 to vector<1x2xf32>
    %3 = arith.subf %2, %1 : vector<1x2xf32>
    %4 = math.exp %3 : vector<1x2xf32>
    %5 = arith.mulf %0, %4 : vector<1x2xf32>
    %6 = arith.addf %5, %1 : vector<1x2xf32>
    %7 = vector.shape_cast %6 : vector<1x2xf32> to vector<1x1x2xf32>
    %cst_3 = arith.constant dense<0.000000e+00> : vector<1xf32>
    %8 = vector.multi_reduction <add>, %7, %cst_3 [1, 2] : vector<1x1x2xf32> to vector<1xf32>
    %9 = vector.shape_cast %8 : vector<1xf32> to vector<1x1x1xf32>
    %10 = vector.extract %9[0, 0, 0] : f32 from vector<1x1x1xf32>
    %cst_4 = arith.constant 5.000000e-01 : f32
    %11 = arith.mulf %cst_4, %10 : f32
    %c0_5 = arith.constant 0 : index
    %c0_6 = arith.constant 0 : index
    %12 = memref.load %arg2[%c0_5, %c0_6] : memref<1x1xf32, #tpu.memory_space<smem>>
    memref.store %11, %arg2[%c0_5, %c0_6] : memref<1x1xf32, #tpu.memory_space<smem>>
    return
  }
}

</mosaic_0001>

<bundles_post_ra>
// kernel: tpu_custom_call.1
= control target key start
LH: loop header
LB: loop body
LE: loop exit
PB: predicated region body
PF: predicated region fallthrough
CT: control target
= control target key end

     0   :  { %7 = vsyncpa [#allocation3], 0  ;;  %s123_s0 = inlined_call_operand.hbm [shape: f32[1,2], index: 0, kind: input, shape index: {}]   ;;  %s124_s1 = inlined_call_operand.vmem [shape: f32[1,2], index: 1, kind: input, shape index: {}]   ;;  %s125_s2 = inlined_call_operand.hbm [shape: f32[1,1], index: 2, kind: output, shape index: {}]  }
   0x1   :  { %8 = vsyncpa [#allocation4], 0  ;;  %s97_s9 = smov [#allocation2]  }
   0x2   :  { %s15_s10 = sshll.u32 %s97_s9, 4  ;;  %s16_s10 = int_to_ptr.vmem [resolvable:$true] %s15_s10 }
   0x3   :  { %s73_s11 = scalar_lea.vmem %s16_s10, 16  ;;  %s77_s12 = scalar_lea.vmem %s16_s10, 32 }
   0x4   :  { %p74_p0 = scmp.ne.s32.totalorder %s16_s10, %s73_s11  ;;  %p78_p1 = scmp.lt.s32.totalorder %s16_s10, %s16_s10 }
   0x5   :  { %p79_p2 = scmp.lt.s32.totalorder %s77_s12, %s73_s11 }
   0x7   :  { %p80_p3 = por %p79_p2, %p78_p1 }
   0x9   :  { %p81_p4 = pnand %p80_p3, %p74_p0 }
   0xb   :  { %84 = shalt.err (!%p81_p4)
}
   0xc   :  { %18 = dma.hbm_to_vmem [thread:$0]  %s123_s0, 16, %s16_s10, [#allocation3]  }
   0xd   :  { %93 = dma.done.wait [#allocation3], 16  }
   0xe   :  { %94 = vsyncadd [#allocation3], 4294967280  ;;  %v25_v0 = vld [vmem:[%s124_s1] sm:$0x1]  ;;  %vm31_vm0 = vcmask 8192   ;;  %s98_s17 = smov [#allocation5]  }
   0xf   :  { %v26_v1 = vsub.f32 0.0, %v25_v0  ;;  %v24_v3 = vld [vmem:[#allocation2] sm:$0x1] }
  0x11   :  { %v27_v2 = vmul.f32 1.442695, %v26_v1 }
  0x13   :  { %63 = vpow2.f32 %v27_v2 }
  0x20   :  { %v64_v4 = vpop.eup %63 }
  0x21   :  { %v29_v5 = vmul.f32 %v64_v4, %v24_v3 }
  0x23   :  { %v30_v6 = vadd.f32 %v29_v5, %v25_v0 }
  0x25   :  { %v32_v7 = vsel %vm31_vm0, %v30_v6, 0.0 }
  0x26   :  { %33 = vadd.xlane.f32.xlu0 %v32_v7 }
  0xaf   :  { %v34_v8 = vpop.xlane.xlu0 %33 }
  0xb0   :  { %v35_v9 = vrot.slane %v34_v8, 4 }
  0xb2   :  { %v36_v10 = vadd.f32 %v35_v9, %v34_v8 }
  0xb4   :  { %v37_v11 = vrot.slane %v36_v10, 2 }
  0xb6   :  { %v38_v12 = vadd.f32 %v37_v11, %v36_v10 }
  0xb8   :  { %v39_v13 = vrot.slane %v38_v12, 1 }
  0xba   :  { %v40_v14 = vadd.f32 %v39_v13, %v38_v12 }
  0xbc   :  { %59 = vpush %v40_v14 }
  0xed   :  { %s60_s0 = spop %59 }
  0xee   :  { %s42_s1 = smul.f32 0.5, %s60_s0 }
  0xf0   :  { %44 = sst [smem:[#allocation5]] %s42_s1 }
  0xf1   :  { %52 = dma.smem_to_hbm %s98_s17, 16, %s125_s2, [#allocation4]  }
  0xf2   :  { %95 = dma.done.wait [#allocation4], 16  }
  0xf3   :  { %96 = vsyncadd [#allocation4], 4294967280 }
  0xf4   :  { %56 = sfence }
  0xf5   :  { %57 = vsyncpa [#allocation3], 1 }
  0xf6   :  { %58 = vsyncpa [#allocation4], 1 }

</bundles_post_ra>
